<compile_context>
chip_gen: v6e
topology: v6e:2x2x1
jax: 0.10.0
libtpu: 0.0.40
codegen_flags: <defaults>
</compile_context>

<pallas_src>
import functools

import jax
import jax.numpy as jnp
from jax.experimental import pallas as pl
from jax.experimental.pallas import tpu as pltpu

_BN_EPS = 1e-5
_LANE = 128


def _round_up(x, m):
    return ((x + m - 1) // m) * m


def _fused_mlp_kernel(*refs, num_hidden, batch_n, w_dims, out_dim):
    """Fully fused MLP forward with HBM->VMEM weight streaming.

    refs layout (inputs, outputs, scratch):
      refs[0]                    : x        [N, D_in]        f32   (VMEM)
      per hidden layer i         : w_i      [K_i, M_i]       bf16  (HBM, streamed)
                                   gamma_i  [1,  M_i]        f32   (VMEM)
                                   beta_i   [1,  M_i]        f32   (VMEM)
      final layer                : w_L      [K_L, M_L]       bf16  (HBM, streamed)
                                   b_L      [1,  M_L]        f32   (VMEM)
      out                        : [N, out_dim]              f32   (VMEM)
      scratch                    : wbuf [2, maxK, maxM] bf16, wsem DMA[2],
                                   h    [N, hidden_p]   bf16
    """
    num_layers = num_hidden + 1
    x_ref = refs[0]

    pos = 1
    w_refs, gamma_refs, beta_refs = [], [], []
    for _ in range(num_hidden):
        w_refs.append(refs[pos])
        gamma_refs.append(refs[pos + 1])
        beta_refs.append(refs[pos + 2])
        pos += 3
    w_refs.append(refs[pos])
    b_last_ref = refs[pos + 1]
    pos += 2
    o_ref = refs[pos]
    pos += 1
    wbuf_ref, wsem_ref, h_ref = refs[pos], refs[pos + 1], refs[pos + 2]

    def weight_copy(i):
        k, m = w_dims[i]
        slot = i & 1
        return pltpu.make_async_copy(
            w_refs[i], wbuf_ref.at[slot, :k, :m], wsem_ref.at[slot])

    # Prime the pipeline with layer 0's weight.
    weight_copy(0).start()

    inv_n = 1.0 / float(batch_n)

    for i in range(num_layers):
        # Prefetch next layer's weight while this layer computes.
        if i + 1 < num_layers:
            weight_copy(i + 1).start()
        weight_copy(i).wait()

        k, m = w_dims[i]
        w = wbuf_ref[i & 1, :k, :m]                     # bf16 [K_i, M_i]
        a = x_ref[...].astype(jnp.bfloat16) if i == 0 else h_ref[...]
        y = jnp.dot(a, w, preferred_element_type=jnp.float32)

        if i < num_hidden:
            # One-pass BatchNorm1d (training mode) over the true batch size.
            s = jnp.sum(y, axis=0, keepdims=True)
            sq = jnp.sum(y * y, axis=0, keepdims=True)
            mean = s * inv_n
            var = jnp.maximum(sq * inv_n - mean * mean, 0.0)
            scale = jax.lax.rsqrt(var + _BN_EPS) * gamma_refs[i][...]   # [1, M_i]
            shift = beta_refs[i][...] - mean * scale                    # [1, M_i]
            # Folded affine + ReLU, written back to the reused bf16 activation
            # scratch (bounds live ranges across the unrolled layer loop).
            h_ref[...] = jnp.maximum(y * scale + shift, 0.0).astype(h_ref.dtype)
        else:
            y = y + b_last_ref[...]
            # Write the unpadded output directly (no wrapper-side slice / HBM copy).
            o_ref[...] = y[:, :out_dim].astype(o_ref.dtype)


def init_mlp_params(key, num_layers, input_dim, hidden_dim, output_dim):
    """Deterministic synthetic init; shapes mirror nn.Linear / nn.BatchNorm1d.

    Weights are stored transposed vs PyTorch ([in, out]) so the kernel computes
    y = x @ W + b.  Output dims are zero-padded to 128-lane multiples (bf16 for the
    MXU); the first layer keeps its true input dim so x needs no wrapper-side pad.
    """
    if num_layers < 1:
        raise ValueError("number of layers should be positive!")

    if num_layers == 1:
        dims = [(input_dim, output_dim)]
    else:
        dims = ([(input_dim, hidden_dim)]
                + [(hidden_dim, hidden_dim)] * (num_layers - 2)
                + [(hidden_dim, output_dim)])

    hidden_p = _round_up(hidden_dim, _LANE) if num_layers > 1 else _LANE

    weights, biases, w_dims = [], [], []
    for i, (din, dout) in enumerate(dims):
        k_stored = din if i == 0 else _round_up(din, _LANE)
        m_stored = _round_up(dout, _LANE)
        w_dims.append((k_stored, m_stored))
        key, kw, kb = jax.random.split(key, 3)
        bound = 1.0 / float(din) ** 0.5
        w = jax.random.uniform(kw, (din, dout), jnp.float32, -bound, bound)
        b = jax.random.uniform(kb, (1, dout), jnp.float32, -bound, bound)
        wp = jnp.zeros((k_stored, m_stored), jnp.bfloat16).at[:din, :dout].set(
            w.astype(jnp.bfloat16))
        bp = jnp.zeros((1, m_stored), jnp.float32).at[:, :dout].set(b)
        weights.append(wp)
        biases.append(bp)

    gammas, betas = [], []
    for _ in range(num_layers - 1):
        # BatchNorm1d(hidden_dim): gamma=1, beta=0 at init.  Padded columns MUST stay
        # 0 in gamma/beta so padded features remain exactly zero through the net.
        gammas.append(jnp.zeros((1, hidden_p), jnp.float32).at[:, :hidden_dim].set(1.0))
        betas.append(jnp.zeros((1, hidden_p), jnp.float32))

    return {
        "num_layers": num_layers,
        "dims": dims,
        "w_dims": w_dims,
        "hidden_p": hidden_p,
        "weights": weights,
        "biases": biases,
        "gammas": gammas,
        "betas": betas,
        "input_dim": input_dim,
        "output_dim": output_dim,
    }


def mlp_forward(params, x):
    """Runs the fused Pallas MLP kernel and returns [N, output_dim] f32."""
    num_layers = params["num_layers"]
    num_hidden = num_layers - 1
    n = x.shape[0]
    output_dim = params["output_dim"]
    w_dims = tuple(params["w_dims"])
    hidden_p = params["hidden_p"]

    vmem_spec = pl.BlockSpec(memory_space=pltpu.MemorySpace.VMEM)
    hbm_spec = pl.BlockSpec(memory_space=pl.ANY)

    args = [x.astype(jnp.float32)]
    in_specs = [vmem_spec]
    for i in range(num_hidden):
        args += [params["weights"][i], params["gammas"][i], params["betas"][i]]
        in_specs += [hbm_spec, vmem_spec, vmem_spec]
    args += [params["weights"][-1], params["biases"][-1]]
    in_specs += [hbm_spec, vmem_spec]

    max_k = max(k for k, _ in w_dims)
    max_m = max(m for _, m in w_dims)

    scratch_shapes = [
        pltpu.VMEM((2, max_k, max_m), jnp.bfloat16),   # streamed-weight double buffer
        pltpu.SemaphoreType.DMA((2,)),
        pltpu.VMEM((n, hidden_p), jnp.bfloat16),       # reused activation scratch
    ]

    # Explicit VMEM budget sized from actual residency, with headroom, capped below
    # physical VMEM (64 MiB/TC on v7x, 128 MiB on v5e/v6e).
    rows_bytes = sum(int(a.size) * a.dtype.itemsize for a in args[1:] if a.shape[0] == 1)
    resident = (int(x.size) * 4 + n * output_dim * 4 + rows_bytes
                + 2 * max_k * max_m * 2            # weight double buffer (bf16)
                + n * hidden_p * 2                 # activation scratch (bf16)
                + 2 * n * max_m * 4)               # f32 temporaries headroom
    try:
        phys_vmem = int(pltpu.get_tpu_info().vmem_capacity_bytes)
    except Exception:
        phys_vmem = 64 << 20
    vmem_limit = int(min(max(2 * resident + (8 << 20), 32 << 20), int(phys_vmem * 0.9)))

    flops = int(sum(2 * n * k * m for k, m in w_dims))
    transcendentals = int(num_hidden * hidden_p)      # one rsqrt per BN feature
    bytes_accessed = int(
        int(x.size) * 4
        + sum(int(a.size) * a.dtype.itemsize for a in args[1:])
        + n * output_dim * 4)

    kernel = functools.partial(
        _fused_mlp_kernel,
        num_hidden=num_hidden, batch_n=n, w_dims=w_dims, out_dim=output_dim)

    out = pl.pallas_call(
        kernel,
        out_shape=jax.ShapeDtypeStruct((n, output_dim), jnp.float32),
        in_specs=in_specs,
        out_specs=vmem_spec,
        scratch_shapes=scratch_shapes,
        compiler_params=pltpu.CompilerParams(vmem_limit_bytes=vmem_limit),
        cost_estimate=pl.CostEstimate(
            flops=flops,
            transcendentals=transcendentals,
            bytes_accessed=bytes_accessed,
        ),
    )(*args)

    return out


def mlp_reference(params, x, *, match_kernel_dtypes=False):
    """Pure-JAX reference.

    match_kernel_dtypes=True  -> activations cast to bf16 before each matmul (same
                                 MXU feeding as the kernel); used for a tight check.
    match_kernel_dtypes=False -> full f32 math; used for a loose semantic check
                                 (difference is only bf16-MXU rounding).
    """
    num_layers = params["num_layers"]
    h = x.astype(jnp.float32)
    for i in range(num_layers):
        din, dout = params["dims"][i]
        w = params["weights"][i][:din, :dout]          # bf16 params are "the" params
        b = params["biases"][i][:, :dout]
        if match_kernel_dtypes:
            y = jnp.dot(h.astype(jnp.bfloat16), w, preferred_element_type=jnp.float32)
        else:
            y = h @ w.astype(jnp.float32)
        if i == num_layers - 1:
            return y + b
        y = y + b  # cancelled by BN below; kept for module fidelity
        mean = jnp.mean(y, axis=0, keepdims=True)
        var = jnp.mean((y - mean) ** 2, axis=0, keepdims=True)
        gamma = params["gammas"][i][:, :dout]
        beta = params["betas"][i][:, :dout]
        y = (y - mean) * jax.lax.rsqrt(var + _BN_EPS) * gamma + beta
        h = jnp.maximum(y, 0.0)


if __name__ == "__main__":
    NUM_LAYERS = 3
    BATCH = 16
    INPUT_DIM = 16
    HIDDEN_DIM = 32
    OUTPUT_DIM = 8

    key = jax.random.PRNGKey(0)
    key, kx = jax.random.split(key)
    x = jax.random.normal(kx, (BATCH, INPUT_DIM), jnp.float32)

    params = init_mlp_params(key, NUM_LAYERS, INPUT_DIM, HIDDEN_DIM, OUTPUT_DIM)

    out = jax.block_until_ready(mlp_forward(params, x))
    assert out.shape == (BATCH, OUTPUT_DIM), out.shape

    # Tight check vs a reference that feeds the MXU identically (bf16 in, f32 acc).
    ref_matched = mlp_reference(params, x, match_kernel_dtypes=True)
    err_matched = float(jnp.max(jnp.abs(out - ref_matched)))
    assert jnp.allclose(out, ref_matched, atol=5e-3, rtol=5e-3), err_matched

    # Loose semantic check vs full-f32 math: tolerance only absorbs bf16-MXU rounding;
    # any structural bug (wrong BN / wiring / padding / DMA slotting) blows past it.
    ref_f32 = mlp_reference(params, x, match_kernel_dtypes=False)
    err_f32 = float(jnp.max(jnp.abs(out - ref_f32)))
    assert jnp.allclose(out, ref_f32, atol=3e-1, rtol=1e-1), err_f32

    print("KERNEL_OK")
</pallas_src>

<mosaic_0001>
module attributes {stable_mosaic.version = 11 : i64} {
  func.func @_fused_mlp_kernel(%arg0: memref<16x16xf32, #tpu.memory_space<vmem>>, %arg1: memref<16x128xbf16, #tpu.memory_space<any>>, %arg2: memref<1x128xf32, #tpu.memory_space<vmem>>, %arg3: memref<1x128xf32, #tpu.memory_space<vmem>>, %arg4: memref<128x128xbf16, #tpu.memory_space<any>>, %arg5: memref<1x128xf32, #tpu.memory_space<vmem>>, %arg6: memref<1x128xf32, #tpu.memory_space<vmem>>, %arg7: memref<128x128xbf16, #tpu.memory_space<any>>, %arg8: memref<1x128xf32, #tpu.memory_space<vmem>>, %arg9: memref<16x8xf32, #tpu.memory_space<vmem>>, %arg10: memref<2x128x128xbf16, #tpu.memory_space<vmem>>, %arg11: memref<2x!tpu.dma_semaphore, #tpu.memory_space<semaphore_mem>>, %arg12: memref<16x128xbf16, #tpu.memory_space<vmem>>) attributes {dimension_semantics = [], scalar_prefetch = 0 : i64, scratch_operands = 3 : i64, tpu.core_type = #tpu.core_type<tc>} {
    %c0_i32 = arith.constant 0 : i32
    %c0_i32_0 = arith.constant 0 : i32
    %c0_i32_1 = arith.constant 0 : i32
    %c0_i32_2 = arith.constant 0 : i32
    %0 = tpu.memref_slice %arg10[%c0_i32, %c0_i32_1, %c0_i32_2] : memref<2x128x128xbf16, #tpu.memory_space<vmem>> -> memref<1x16x128xbf16, #tpu.memory_space<vmem>>
    %1 = tpu.memref_squeeze %0 : memref<1x16x128xbf16, #tpu.memory_space<vmem>> -> memref<16x128xbf16, #tpu.memory_space<vmem>>
    %2 = tpu.memref_slice %arg11[%c0_i32_0] : memref<2x!tpu.dma_semaphore, #tpu.memory_space<semaphore_mem>> -> memref<1x!tpu.dma_semaphore, #tpu.memory_space<semaphore_mem>>
    %3 = tpu.memref_squeeze %2 : memref<1x!tpu.dma_semaphore, #tpu.memory_space<semaphore_mem>> -> memref<!tpu.dma_semaphore, #tpu.memory_space<semaphore_mem>>
    tpu.enqueue_dma source(%arg1 : memref<16x128xbf16, #tpu.memory_space<any>>) target(%1 : memref<16x128xbf16, #tpu.memory_space<vmem>>) target_semaphore(%3 : memref<!tpu.dma_semaphore, #tpu.memory_space<semaphore_mem>>)
    %c1_i32 = arith.constant 1 : i32
    %c1_i32_3 = arith.constant 1 : i32
    %c0_i32_4 = arith.constant 0 : i32
    %c0_i32_5 = arith.constant 0 : i32
    %4 = tpu.memref_slice %arg10[%c1_i32, %c0_i32_4, %c0_i32_5] : memref<2x128x128xbf16, #tpu.memory_space<vmem>> -> memref<1x128x128xbf16, #tpu.memory_space<vmem>>
    %5 = tpu.memref_squeeze %4 : memref<1x128x128xbf16, #tpu.memory_space<vmem>> -> memref<128x128xbf16, #tpu.memory_space<vmem>>
    %6 = tpu.memref_slice %arg11[%c1_i32_3] : memref<2x!tpu.dma_semaphore, #tpu.memory_space<semaphore_mem>> -> memref<1x!tpu.dma_semaphore, #tpu.memory_space<semaphore_mem>>
    %7 = tpu.memref_squeeze %6 : memref<1x!tpu.dma_semaphore, #tpu.memory_space<semaphore_mem>> -> memref<!tpu.dma_semaphore, #tpu.memory_space<semaphore_mem>>
    tpu.enqueue_dma source(%arg4 : memref<128x128xbf16, #tpu.memory_space<any>>) target(%5 : memref<128x128xbf16, #tpu.memory_space<vmem>>) target_semaphore(%7 : memref<!tpu.dma_semaphore, #tpu.memory_space<semaphore_mem>>)
    %c0_i32_6 = arith.constant 0 : i32
    %c0_i32_7 = arith.constant 0 : i32
    %c0_i32_8 = arith.constant 0 : i32
    %c0_i32_9 = arith.constant 0 : i32
    %8 = tpu.memref_slice %arg10[%c0_i32_6, %c0_i32_8, %c0_i32_9] : memref<2x128x128xbf16, #tpu.memory_space<vmem>> -> memref<1x16x128xbf16, #tpu.memory_space<vmem>>
    %9 = tpu.memref_squeeze %8 : memref<1x16x128xbf16, #tpu.memory_space<vmem>> -> memref<16x128xbf16, #tpu.memory_space<vmem>>
    %10 = tpu.memref_slice %arg11[%c0_i32_7] : memref<2x!tpu.dma_semaphore, #tpu.memory_space<semaphore_mem>> -> memref<1x!tpu.dma_semaphore, #tpu.memory_space<semaphore_mem>>
    %11 = tpu.memref_squeeze %10 : memref<1x!tpu.dma_semaphore, #tpu.memory_space<semaphore_mem>> -> memref<!tpu.dma_semaphore, #tpu.memory_space<semaphore_mem>>
    tpu.wait_dma2 semaphore(%11 : memref<!tpu.dma_semaphore, #tpu.memory_space<semaphore_mem>>) src(%arg1 : memref<16x128xbf16, #tpu.memory_space<any>>) dst(%9 : memref<16x128xbf16, #tpu.memory_space<vmem>>)
    %c0 = arith.constant 0 : index
    %c0_10 = arith.constant 0 : index
    %c0_11 = arith.constant 0 : index
    %12 = vector.load %arg10[%c0, %c0_10, %c0_11] : memref<2x128x128xbf16, #tpu.memory_space<vmem>>, vector<1x16x128xbf16>
    %13 = vector.shape_cast %12 : vector<1x16x128xbf16> to vector<16x128xbf16>
    %c0_12 = arith.constant 0 : index
    %c0_13 = arith.constant 0 : index
    %14 = vector.load %arg0[%c0_12, %c0_13] : memref<16x16xf32, #tpu.memory_space<vmem>>, vector<16x16xf32>
    %15 = arith.truncf %14 : vector<16x16xf32> to vector<16x16xbf16>
    %cst = arith.constant dense<0.000000e+00> : vector<16x128xf32>
    %16 = tpu.matmul %15, %13, %cst {dimension_numbers = #tpu.dot_dimension_numbers<[1], [0], [0], [1], [0, 0, 1, 1], [], []>} : vector<16x16xbf16>, vector<16x128xbf16>, vector<16x128xf32> -> vector<16x128xf32>
    %cst_14 = arith.constant dense<0.000000e+00> : vector<128xf32>
    %17 = vector.multi_reduction <add>, %16, %cst_14 [0] : vector<16x128xf32> to vector<128xf32>
    %18 = vector.shape_cast %17 : vector<128xf32> to vector<1x128xf32>
    %19 = arith.mulf %16, %16 : vector<16x128xf32>
    %cst_15 = arith.constant dense<0.000000e+00> : vector<128xf32>
    %20 = vector.multi_reduction <add>, %19, %cst_15 [0] : vector<16x128xf32> to vector<128xf32>
    %21 = vector.shape_cast %20 : vector<128xf32> to vector<1x128xf32>
    %cst_16 = arith.constant 6.250000e-02 : f32
    %22 = vector.broadcast %cst_16 : f32 to vector<1x128xf32>
    %23 = arith.mulf %18, %22 : vector<1x128xf32>
    %cst_17 = arith.constant 6.250000e-02 : f32
    %24 = vector.broadcast %cst_17 : f32 to vector<1x128xf32>
    %25 = arith.mulf %21, %24 : vector<1x128xf32>
    %26 = arith.mulf %23, %23 : vector<1x128xf32>
    %27 = arith.subf %25, %26 : vector<1x128xf32>
    %cst_18 = arith.constant 0.000000e+00 : f32
    %28 = vector.broadcast %cst_18 : f32 to vector<1x128xf32>
    %29 = arith.maximumf %27, %28 : vector<1x128xf32>
    %cst_19 = arith.constant 9.99999974E-6 : f32
    %30 = vector.broadcast %cst_19 : f32 to vector<1x128xf32>
    %31 = arith.addf %29, %30 : vector<1x128xf32>
    %32 = math.rsqrt %31 : vector<1x128xf32>
    %c0_20 = arith.constant 0 : index
    %c0_21 = arith.constant 0 : index
    %33 = vector.load %arg2[%c0_20, %c0_21] : memref<1x128xf32, #tpu.memory_space<vmem>>, vector<1x128xf32>
    %34 = arith.mulf %32, %33 : vector<1x128xf32>
    %c0_22 = arith.constant 0 : index
    %c0_23 = arith.constant 0 : index
    %35 = vector.load %arg3[%c0_22, %c0_23] : memref<1x128xf32, #tpu.memory_space<vmem>>, vector<1x128xf32>
    %36 = arith.mulf %23, %34 : vector<1x128xf32>
    %37 = arith.subf %35, %36 : vector<1x128xf32>
    %38 = vector.broadcast %34 : vector<1x128xf32> to vector<16x128xf32>
    %39 = arith.mulf %16, %38 : vector<16x128xf32>
    %40 = vector.broadcast %37 : vector<1x128xf32> to vector<16x128xf32>
    %41 = arith.addf %39, %40 : vector<16x128xf32>
    %cst_24 = arith.constant 0.000000e+00 : f32
    %42 = vector.broadcast %cst_24 : f32 to vector<16x128xf32>
    %43 = arith.maximumf %41, %42 : vector<16x128xf32>
    %44 = arith.truncf %43 : vector<16x128xf32> to vector<16x128xbf16>
    %c0_25 = arith.constant 0 : index
    %c0_26 = arith.constant 0 : index
    %45 = vector.load %arg12[%c0_25, %c0_26] : memref<16x128xbf16, #tpu.memory_space<vmem>>, vector<16x128xbf16>
    tpu.vector_store %arg12[%c0_25, %c0_26], %44 {strides = array<i32>} : memref<16x128xbf16, #tpu.memory_space<vmem>>, vector<16x128xbf16>,
    %c0_i32_27 = arith.constant 0 : i32
    %c0_i32_28 = arith.constant 0 : i32
    %c0_i32_29 = arith.constant 0 : i32
    %c0_i32_30 = arith.constant 0 : i32
    %46 = tpu.memref_slice %arg10[%c0_i32_27, %c0_i32_29, %c0_i32_30] : memref<2x128x128xbf16, #tpu.memory_space<vmem>> -> memref<1x128x128xbf16, #tpu.memory_space<vmem>>
    %47 = tpu.memref_squeeze %46 : memref<1x128x128xbf16, #tpu.memory_space<vmem>> -> memref<128x128xbf16, #tpu.memory_space<vmem>>
    %48 = tpu.memref_slice %arg11[%c0_i32_28] : memref<2x!tpu.dma_semaphore, #tpu.memory_space<semaphore_mem>> -> memref<1x!tpu.dma_semaphore, #tpu.memory_space<semaphore_mem>>
    %49 = tpu.memref_squeeze %48 : memref<1x!tpu.dma_semaphore, #tpu.memory_space<semaphore_mem>> -> memref<!tpu.dma_semaphore, #tpu.memory_space<semaphore_mem>>
    tpu.enqueue_dma source(%arg7 : memref<128x128xbf16, #tpu.memory_space<any>>) target(%47 : memref<128x128xbf16, #tpu.memory_space<vmem>>) target_semaphore(%49 : memref<!tpu.dma_semaphore, #tpu.memory_space<semaphore_mem>>)
    %c1_i32_31 = arith.constant 1 : i32
    %c1_i32_32 = arith.constant 1 : i32
    %c0_i32_33 = arith.constant 0 : i32
    %c0_i32_34 = arith.constant 0 : i32
    %50 = tpu.memref_slice %arg10[%c1_i32_31, %c0_i32_33, %c0_i32_34] : memref<2x128x128xbf16, #tpu.memory_space<vmem>> -> memref<1x128x128xbf16, #tpu.memory_space<vmem>>
    %51 = tpu.memref_squeeze %50 : memref<1x128x128xbf16, #tpu.memory_space<vmem>> -> memref<128x128xbf16, #tpu.memory_space<vmem>>
    %52 = tpu.memref_slice %arg11[%c1_i32_32] : memref<2x!tpu.dma_semaphore, #tpu.memory_space<semaphore_mem>> -> memref<1x!tpu.dma_semaphore, #tpu.memory_space<semaphore_mem>>
    %53 = tpu.memref_squeeze %52 : memref<1x!tpu.dma_semaphore, #tpu.memory_space<semaphore_mem>> -> memref<!tpu.dma_semaphore, #tpu.memory_space<semaphore_mem>>
    tpu.wait_dma2 semaphore(%53 : memref<!tpu.dma_semaphore, #tpu.memory_space<semaphore_mem>>) src(%arg4 : memref<128x128xbf16, #tpu.memory_space<any>>) dst(%51 : memref<128x128xbf16, #tpu.memory_space<vmem>>)
    %c1 = arith.constant 1 : index
    %c0_35 = arith.constant 0 : index
    %c0_36 = arith.constant 0 : index
    %54 = vector.load %arg10[%c1, %c0_35, %c0_36] : memref<2x128x128xbf16, #tpu.memory_space<vmem>>, vector<1x128x128xbf16>
    %55 = vector.shape_cast %54 : vector<1x128x128xbf16> to vector<128x128xbf16>
    %c0_37 = arith.constant 0 : index
    %c0_38 = arith.constant 0 : index
    %56 = vector.load %arg12[%c0_37, %c0_38] : memref<16x128xbf16, #tpu.memory_space<vmem>>, vector<16x128xbf16>
    %cst_39 = arith.constant dense<0.000000e+00> : vector<16x128xf32>
    %57 = tpu.matmul %56, %55, %cst_39 {dimension_numbers = #tpu.dot_dimension_numbers<[1], [0], [0], [1], [0, 0, 1, 1], [], []>} : vector<16x128xbf16>, vector<128x128xbf16>, vector<16x128xf32> -> vector<16x128xf32>
    %cst_40 = arith.constant dense<0.000000e+00> : vector<128xf32>
    %58 = vector.multi_reduction <add>, %57, %cst_40 [0] : vector<16x128xf32> to vector<128xf32>
    %59 = vector.shape_cast %58 : vector<128xf32> to vector<1x128xf32>
    %60 = arith.mulf %57, %57 : vector<16x128xf32>
    %cst_41 = arith.constant dense<0.000000e+00> : vector<128xf32>
    %61 = vector.multi_reduction <add>, %60, %cst_41 [0] : vector<16x128xf32> to vector<128xf32>
    %62 = vector.shape_cast %61 : vector<128xf32> to vector<1x128xf32>
    %cst_42 = arith.constant 6.250000e-02 : f32
    %63 = vector.broadcast %cst_42 : f32 to vector<1x128xf32>
    %64 = arith.mulf %59, %63 : vector<1x128xf32>
    %cst_43 = arith.constant 6.250000e-02 : f32
    %65 = vector.broadcast %cst_43 : f32 to vector<1x128xf32>
    %66 = arith.mulf %62, %65 : vector<1x128xf32>
    %67 = arith.mulf %64, %64 : vector<1x128xf32>
    %68 = arith.subf %66, %67 : vector<1x128xf32>
    %cst_44 = arith.constant 0.000000e+00 : f32
    %69 = vector.broadcast %cst_44 : f32 to vector<1x128xf32>
    %70 = arith.maximumf %68, %69 : vector<1x128xf32>
    %cst_45 = arith.constant 9.99999974E-6 : f32
    %71 = vector.broadcast %cst_45 : f32 to vector<1x128xf32>
    %72 = arith.addf %70, %71 : vector<1x128xf32>
    %73 = math.rsqrt %72 : vector<1x128xf32>
    %c0_46 = arith.constant 0 : index
    %c0_47 = arith.constant 0 : index
    %74 = vector.load %arg5[%c0_46, %c0_47] : memref<1x128xf32, #tpu.memory_space<vmem>>, vector<1x128xf32>
    %75 = arith.mulf %73, %74 : vector<1x128xf32>
    %c0_48 = arith.constant 0 : index
    %c0_49 = arith.constant 0 : index
    %76 = vector.load %arg6[%c0_48, %c0_49] : memref<1x128xf32, #tpu.memory_space<vmem>>, vector<1x128xf32>
    %77 = arith.mulf %64, %75 : vector<1x128xf32>
    %78 = arith.subf %76, %77 : vector<1x128xf32>
    %79 = vector.broadcast %75 : vector<1x128xf32> to vector<16x128xf32>
    %80 = arith.mulf %57, %79 : vector<16x128xf32>
    %81 = vector.broadcast %78 : vector<1x128xf32> to vector<16x128xf32>
    %82 = arith.addf %80, %81 : vector<16x128xf32>
    %cst_50 = arith.constant 0.000000e+00 : f32
    %83 = vector.broadcast %cst_50 : f32 to vector<16x128xf32>
    %84 = arith.maximumf %82, %83 : vector<16x128xf32>
    %85 = arith.truncf %84 : vector<16x128xf32> to vector<16x128xbf16>
    %c0_51 = arith.constant 0 : index
    %c0_52 = arith.constant 0 : index
    %86 = vector.load %arg12[%c0_51, %c0_52] : memref<16x128xbf16, #tpu.memory_space<vmem>>, vector<16x128xbf16>
    tpu.vector_store %arg12[%c0_51, %c0_52], %85 {strides = array<i32>} : memref<16x128xbf16, #tpu.memory_space<vmem>>, vector<16x128xbf16>,
    %c0_i32_53 = arith.constant 0 : i32
    %c0_i32_54 = arith.constant 0 : i32
    %c0_i32_55 = arith.constant 0 : i32
    %c0_i32_56 = arith.constant 0 : i32
    %87 = tpu.memref_slice %arg10[%c0_i32_53, %c0_i32_55, %c0_i32_56] : memref<2x128x128xbf16, #tpu.memory_space<vmem>> -> memref<1x128x128xbf16, #tpu.memory_space<vmem>>
    %88 = tpu.memref_squeeze %87 : memref<1x128x128xbf16, #tpu.memory_space<vmem>> -> memref<128x128xbf16, #tpu.memory_space<vmem>>
    %89 = tpu.memref_slice %arg11[%c0_i32_54] : memref<2x!tpu.dma_semaphore, #tpu.memory_space<semaphore_mem>> -> memref<1x!tpu.dma_semaphore, #tpu.memory_space<semaphore_mem>>
    %90 = tpu.memref_squeeze %89 : memref<1x!tpu.dma_semaphore, #tpu.memory_space<semaphore_mem>> -> memref<!tpu.dma_semaphore, #tpu.memory_space<semaphore_mem>>
    tpu.wait_dma2 semaphore(%90 : memref<!tpu.dma_semaphore, #tpu.memory_space<semaphore_mem>>) src(%arg7 : memref<128x128xbf16, #tpu.memory_space<any>>) dst(%88 : memref<128x128xbf16, #tpu.memory_space<vmem>>)
    %c0_57 = arith.constant 0 : index
    %c0_58 = arith.constant 0 : index
    %c0_59 = arith.constant 0 : index
    %91 = vector.load %arg10[%c0_57, %c0_58, %c0_59] : memref<2x128x128xbf16, #tpu.memory_space<vmem>>, vector<1x128x128xbf16>
    %92 = vector.shape_cast %91 : vector<1x128x128xbf16> to vector<128x128xbf16>
    %c0_60 = arith.constant 0 : index
    %c0_61 = arith.constant 0 : index
    %93 = vector.load %arg12[%c0_60, %c0_61] : memref<16x128xbf16, #tpu.memory_space<vmem>>, vector<16x128xbf16>
    %cst_62 = arith.constant dense<0.000000e+00> : vector<16x128xf32>
    %94 = tpu.matmul %93, %92, %cst_62 {dimension_numbers = #tpu.dot_dimension_numbers<[1], [0], [0], [1], [0, 0, 1, 1], [], []>} : vector<16x128xbf16>, vector<128x128xbf16>, vector<16x128xf32> -> vector<16x128xf32>
    %c0_63 = arith.constant 0 : index
    %c0_64 = arith.constant 0 : index
    %95 = vector.load %arg8[%c0_63, %c0_64] : memref<1x128xf32, #tpu.memory_space<vmem>>, vector<1x128xf32>
    %96 = vector.broadcast %95 : vector<1x128xf32> to vector<16x128xf32>
    %97 = arith.addf %94, %96 : vector<16x128xf32>
    %98 = vector.extract_strided_slice %97 {offsets = [0, 0], sizes = [16, 8], strides = [1, 1]} : vector<16x128xf32> to vector<16x8xf32>
    %c0_65 = arith.constant 0 : index
    %c0_66 = arith.constant 0 : index
    %99 = vector.load %arg9[%c0_65, %c0_66] : memref<16x8xf32, #tpu.memory_space<vmem>>, vector<16x8xf32>
    tpu.vector_store %arg9[%c0_65, %c0_66], %98 {strides = array<i32>} : memref<16x8xf32, #tpu.memory_space<vmem>>, vector<16x8xf32>,
    return
  }
}

</mosaic_0001>

<bundles_post_ra>
// kernel: tpu_custom_call.1
= control target key start
LH: loop header
LB: loop body
LE: loop exit
PB: predicated region body
PF: predicated region fallthrough
CT: control target
= control target key end

     0   :  { %14 = vsyncpa [#allocation6], 0  ;;  %s729_s30 = smov [#allocation5]   ;;  %s866_s0 = inlined_call_operand.hbm [shape: f32[16,16], index: 0, kind: input, shape index: {}]   ;;  %s867_s1 = inlined_call_operand.hbm [shape: bf16[16,128], index: 1, kind: input, shape index: {}]   ;;  %s868_s2 = inlined_call_operand.vmem [shape: f32[1,128], index: 2, kind: input, shape index: {}]   ;;  %s869_s3 = inlined_call_operand.vmem [shape: f32[1,128], index: 3, kind: input, shape index: {}]   ;;  %s870_s4 = inlined_call_operand.hbm [shape: bf16[128,128], index: 4, kind: input, shape index: {}]   ;;  %s871_s5 = inlined_call_operand.vmem [shape: f32[1,128], index: 5, kind: input, shape index: {}]   ;;  %s872_s6 = inlined_call_operand.vmem [shape: f32[1,128], index: 6, kind: input, shape index: {}]   ;;  %s873_s7 = inlined_call_operand.hbm [shape: bf16[128,128], index: 7, kind: input, shape index: {}]   ;;  %s874_s8 = inlined_call_operand.vmem [shape: f32[1,128], index: 8, kind: input, shape index: {}]   ;;  %s875_s9 = inlined_call_operand.vmem [shape: f32[16,8], index: 9, kind: output, shape index: {}]  }
   0x1   :  { %s20_s10 = sshll.u32 %s729_s30, 4  ;;  %s21_s10 = int_to_ptr.vmem [resolvable:$true] %s20_s10 }
   0x2   :  { %s649_s11 = scalar_lea.vmem %s21_s10, 256  ;;  %p654_p1 = scmp.lt.s32.totalorder %s21_s10, %s21_s10 }
   0x3   :  { %p650_p0 = scmp.ne.s32.totalorder %s21_s10, %s649_s11  ;;  %p655_p2 = scmp.lt.s32.totalorder %s649_s11, %s649_s11 }
   0x5   :  { %p656_p3 = por %p655_p2, %p654_p1 }
   0x7   :  { %p657_p4 = pnand %p656_p3, %p650_p0 }
   0x9   :  { %660 = shalt.err (!%p657_p4)
}
   0xa   :  { %s730_s12 = smov 128   ;;  %s731_s13 = smov 8  }
   0xb   :  { %26 = dma.hbm_to_vmem [thread:$0]  %s866_s0, 256, %s21_s10, [#allocation6], %s730_s12, %s730_s12, %s731_s13  }
   0xc   :  { %721 = dma.done.wait [#allocation6], 256  }
   0xd   :  { %722 = vsyncadd [#allocation6], 4294967040  ;;  %s732_s16 = smov [#allocation2]   ;;  %s733_s18 = smov [#allocation2 + $0x40]  }
   0xe   :  { %s48_s17 = sshll.u32 %s732_s16, 4  ;;  %s61_s19 = sshll.u32 %s733_s18, 4  ;;  %s789_s17 = int_to_ptr.vmem [resolvable:$true] %s48_s17  ;;  %s62_s19 = int_to_ptr.vmem [resolvable:$true] %s61_s19 }
   0xf   :  { %s669_s20 = scalar_lea.vmem %s789_s17, 128  ;;  %s673_s21 = scalar_lea.vmem %s789_s17, 2048 }
  0x10   :  { %p670_p5 = scmp.ne.s32.totalorder %s789_s17, %s669_s20  ;;  %p674_p6 = scmp.lt.s32.totalorder %s789_s17, %s789_s17 }
  0x11   :  { %p675_p7 = scmp.lt.s32.totalorder %s673_s21, %s669_s20 }
  0x13   :  { %p676_p8 = por %p675_p7, %p674_p6 }
  0x15   :  { %p677_p9 = pnand %p676_p8, %p670_p5 }
  0x17   :  { %680 = shalt.err (!%p677_p9)  }
  0x18   :  { %51 = dma.hbm_to_vmem [thread:$0]  %s867_s1, 128, %s789_s17, [#allocation3] }
  0x19   :  { %s689_s23 = scalar_lea.vmem %s62_s19, 1024  ;;  %p694_p11 = scmp.lt.s32.totalorder %s62_s19, %s789_s17 }
  0x1a   :  { %p690_p10 = scmp.ne.s32.totalorder %s62_s19, %s689_s23  ;;  %p695_p12 = scmp.lt.s32.totalorder %s673_s21, %s689_s23 }
  0x1c   :  { %p696_p13 = por %p695_p12, %p694_p11 }
  0x1e   :  { %p697_p0 = pnand %p696_p13, %p690_p10 }
  0x20   :  { %700 = shalt.err (!%p697_p0)  }
  0x21   :  { %64 = dma.hbm_to_vmem [thread:$0]  %s870_s4, 1024, %s62_s19, [#allocation3 + $0x1] }
  0x22   :  { %723 = dma.done.wait [#allocation3], 128 }
  0x23   :  { %724 = vsyncadd [#allocation3], 4294967168  ;;  %v734_v0 = vmov 0.0   ;;  %vm735_vm0 = vmmov 0   ;;  %v618_v1 = vld [vmem:[#allocation2] sm:$0xff]   ;;  %v71_v2 = vld [vmem:[#allocation5] sm:$0xff] }
  0x24   :  { %565 = vmatprep.subr.bf16.mxu0 %v734_v0  ;;  %567 = vmatprep.mubr.msk.bf16.mxu0 %vm735_vm0, %v734_v0  ;;  %v72_v3 = vld [vmem:[#allocation5 + $0x8] sm:$0xff]  ;;  %s709_s1 = scalar_lea.vmem %s789_s17, 1024 }
  0x25   :  { %p710_p1 = scmp.ne.s32.totalorder %s789_s17, %s709_s1  ;;  %p715_p2 = scmp.lt.s32.totalorder %s673_s21, %s709_s1 }
  0x27   :  { %p716_p3 = por %p715_p2, %p674_p6 }
  0x29   :  { %p717_p4 = pnand %p716_p3, %p710_p1 }
  0x2b   :  { %720 = shalt.err (!%p717_p4)  }
  0x2c   :  { %189 = dma.hbm_to_vmem [thread:$0]  %s873_s7, 1024, %s789_s17, [#allocation3]  ;;  %566 = vmatpush3.bf16.msra.mxu0 %v618_v1  ;;  %v73_v4 = vpack.c.bf16 %v72_v3, %v71_v2  ;;  %vm80_vm1 = vcmask 130048   ;;  %v153_v31 = vlaneseq  ;;  %v148_v33 = vld [vmem:[%s868_s2] sm:$0x1] }
  0x2d   :  { %v150_v37 = vld [vmem:[%s869_s3] sm:$0x1] }
  0x2e   :  { %v154_v32 = vshrl.u32 %v153_v31, 7 }
  0x2f   :  { %568 = vmatmul.mubr.msk.bf16.vlgmr.msra.gmra.mxu0 %vm80_vm1, %v73_v4 }
  0x30   :  { %v822_v34 = vsub.s32 0, %v154_v32 }
  0xef   :  { %v118_v5 = vpop.f32.mrf.mxu0 }
  0xf0   :  { %v132_v8 = vmul.f32 %v118_v5, %v118_v5 }
  0xf1   :  { %v569_v6 = vpop.f32.mrf.mxu0 }
  0xf3   :  { %v121_v7 = vpop.f32.mrf.mxu0 }
  0xf4   :  { %v125_v9 = vadd.f32 %v121_v7, %v118_v5  ;;  %v133_v10 = vmul.f32 %v121_v7, %v121_v7 }
  0xf5   :  { %v570_v11 = vpop.f32.mrf.mxu0 }
  0xf6   :  { %v126_v12 = vrot.slane %v125_v9, 4  ;;  %v134_v13 = vadd.f32 %v133_v10, %v132_v8 }
  0xf8   :  { %v127_v14 = vadd.f32 %v126_v12, %v125_v9  ;;  %v135_v15 = vrot.slane %v134_v13, 4 }
  0xfa   :  { %v128_v16 = vrot.slane %v127_v14, 2  ;;  %v136_v17 = vadd.f32 %v135_v15, %v134_v13 }
  0xfc   :  { %v129_v18 = vadd.f32 %v128_v16, %v127_v14  ;;  %v137_v19 = vrot.slane %v136_v17, 2 }
  0xfe   :  { %v130_v20 = vrot.slane %v129_v18, 1  ;;  %v138_v21 = vadd.f32 %v137_v19, %v136_v17 }
 0x100   :  { %v131_v22 = vadd.f32 %v130_v20, %v129_v18  ;;  %v139_v23 = vrot.slane %v138_v21, 1 }
 0x102   :  { %v140_v24 = vadd.f32 %v139_v23, %v138_v21  ;;  %v141_v25 = vmul.f32 0.0625, %v131_v22 }
 0x104   :  { %v142_v26 = vmul.f32 0.0625, %v140_v24  ;;  %v143_v27 = vmul.f32 %v141_v25, %v141_v25 }
 0x106   :  { %v144_v28 = vsub.f32 %v142_v26, %v143_v27 }
 0x108   :  { %v145_v29 = vmax.f32 %v144_v28, 0.0 }
 0x10a   :  { %v146_v30 = vadd.f32 1e-05, %v145_v29 }
 0x10c   :  { %619 = vrsqrt.f32 %v146_v30 }
 0x119   :  { %v620_v35 = vpop.eup %619 }
 0x11a   :  { %v149_v36 = vmul.f32 %v620_v35, %v148_v33 }
 0x11c   :  { %v151_v38 = vmul.f32 %v149_v36, %v141_v25  ;;  %v156_v39 = vrot.slane %v149_v36, %v822_v34 }
 0x11e   :  { %v152_v40 = vsub.f32 %v150_v37, %v151_v38  ;;  %v157_v41 = vmul.f32 %v156_v39, %v118_v5  ;;  %v158_v42 = vmul.f32 %v156_v39, %v121_v7 }
 0x120   :  { %v163_v43 = vrot.slane %v152_v40, %v822_v34 }
 0x122   :  { %v165_v44 = vadd.f32 %v163_v43, %v157_v41  ;;  %v166_v45 = vadd.f32 %v163_v43, %v158_v42 }
 0x124   :  { %v167_v46 = vmax.f32 %v165_v44, 0.0  ;;  %v168_v47 = vmax.f32 %v166_v45, 0.0 }
 0x126   :  { %v538_v48 = vpack.c.bf16 %v168_v47, %v167_v46 }
 0x128   :  { %539 = vst [vmem:[#allocation4] sm:$0xff] %v538_v48  }
 0x129   :  { %725 = dma.done.wait [#allocation3 + $0x1], 1024 }
 0x12a   :  { %726 = vsyncadd [#allocation3 + $0x1], 4294966272  ;;  %571 = vmatprep.subr.bf16.mxu1 %v734_v0  ;;  %587 = vmatprep.mubr.msk.bf16.mxu1 %vm735_vm0, %v734_v0  ;;  %v621_v49 = vld [vmem:[#allocation2 + $0x78] sm:$0xff]   ;;  %v622_v50 = vld [vmem:[#allocation2 + $0x70] sm:$0xff]  }
 0x12b   :  { %572 = vmatpush3.bf16.msra.mxu1 %v621_v49  ;;  %v623_v51 = vld [vmem:[#allocation2 + $0x68] sm:$0xff]   ;;  %v624_v52 = vld [vmem:[#allocation2 + $0x60] sm:$0xff]   ;;  %v625_v53 = vld [vmem:[#allocation2 + $0x58] sm:$0xff]  }
 0x12c   :  { %573 = vmatprep.subr.bf16.mxu1 %v734_v0  ;;  %v626_v54 = vld [vmem:[#allocation2 + $0x50] sm:$0xff]   ;;  %v627_v55 = vld [vmem:[#allocation2 + $0x48] sm:$0xff]   ;;  %v628_v56 = vld [vmem:[#allocation2 + $0x40] sm:$0xff]  }
 0x12d   :  { %v330_v21 = vld [vmem:[%s871_s5] sm:$0x1] }
 0x12e   :  { %v332_v24 = vld [vmem:[%s872_s6] sm:$0x1] }
 0x12f   :  { %574 = vmatpush3.bf16.msra.mxu1 %v622_v50  ;;  %v629_v57 = vld [vmem:[#allocation4] sm:$0xff]  }
 0x130   :  { %575 = vmatprep.subr.bf16.mxu1 %v734_v0 }
 0x133   :  { %576 = vmatpush3.bf16.msra.mxu1 %v623_v51 }
 0x134   :  { %577 = vmatprep.subr.bf16.mxu1 %v734_v0 }
 0x137   :  { %578 = vmatpush3.bf16.msra.mxu1 %v624_v52 }
 0x138   :  { %579 = vmatprep.subr.bf16.mxu1 %v734_v0 }
 0x13b   :  { %580 = vmatpush3.bf16.msra.mxu1 %v625_v53 }
 0x13c   :  { %581 = vmatprep.subr.bf16.mxu1 %v734_v0 }
 0x13f   :  { %582 = vmatpush3.bf16.msra.mxu1 %v626_v54 }
 0x140   :  { %583 = vmatprep.subr.bf16.mxu1 %v734_v0 }
 0x143   :  { %584 = vmatpush3.bf16.msra.mxu1 %v627_v55 }
 0x144   :  { %585 = vmatprep.subr.bf16.mxu1 %v734_v0 }
 0x147   :  { %586 = vmatpush3.bf16.msra.mxu1 %v628_v56 }
 0x14a   :  { %588 = vmatmul.mubr.bf16.vlgmr.msra.gmra.mxu1 %v629_v57 }
 0x20a   :  { %v300_v58 = vpop.f32.mrf.mxu1 }
 0x20b   :  { %v314_v61 = vmul.f32 %v300_v58, %v300_v58 }
 0x20c   :  { %v589_v59 = vpop.f32.mrf.mxu1 }
 0x20e   :  { %v303_v60 = vpop.f32.mrf.mxu1 }
 0x20f   :  { %v307_v62 = vadd.f32 %v303_v60, %v300_v58  ;;  %v315_v63 = vmul.f32 %v303_v60, %v303_v60 }
 0x210   :  { %v590_v1 = vpop.f32.mrf.mxu1 }
 0x211   :  { %v308_v2 = vrot.slane %v307_v62, 4  ;;  %v316_v3 = vadd.f32 %v315_v63, %v314_v61 }
 0x213   :  { %v309_v4 = vadd.f32 %v308_v2, %v307_v62  ;;  %v317_v5 = vrot.slane %v316_v3, 4 }
 0x215   :  { %v310_v6 = vrot.slane %v309_v4, 2  ;;  %v318_v7 = vadd.f32 %v317_v5, %v316_v3 }
 0x217   :  { %v311_v8 = vadd.f32 %v310_v6, %v309_v4  ;;  %v319_v9 = vrot.slane %v318_v7, 2 }
 0x219   :  { %v312_v10 = vrot.slane %v311_v8, 1  ;;  %v320_v11 = vadd.f32 %v319_v9, %v318_v7 }
 0x21b   :  { %v313_v12 = vadd.f32 %v312_v10, %v311_v8  ;;  %v321_v13 = vrot.slane %v320_v11, 1 }
 0x21d   :  { %v322_v14 = vadd.f32 %v321_v13, %v320_v11  ;;  %v323_v15 = vmul.f32 0.0625, %v313_v12 }
 0x21f   :  { %v324_v16 = vmul.f32 0.0625, %v322_v14  ;;  %v325_v17 = vmul.f32 %v323_v15, %v323_v15 }
 0x221   :  { %v326_v18 = vsub.f32 %v324_v16, %v325_v17 }
 0x223   :  { %v327_v19 = vmax.f32 %v326_v18, 0.0 }
 0x225   :  { %v328_v20 = vadd.f32 1e-05, %v327_v19 }
 0x227   :  { %630 = vrsqrt.f32 %v328_v20 }
 0x234   :  { %v631_v22 = vpop.eup %630 }
 0x235   :  { %v331_v23 = vmul.f32 %v631_v22, %v330_v21 }
 0x237   :  { %v333_v25 = vmul.f32 %v331_v23, %v323_v15  ;;  %v338_v26 = vrot.slane %v331_v23, %v822_v34 }
 0x239   :  { %v334_v27 = vsub.f32 %v332_v24, %v333_v25  ;;  %v339_v28 = vmul.f32 %v338_v26, %v300_v58  ;;  %v340_v29 = vmul.f32 %v338_v26, %v303_v60 }
 0x23b   :  { %v345_v30 = vrot.slane %v334_v27, %v822_v34 }
 0x23d   :  { %v347_v31 = vadd.f32 %v345_v30, %v339_v28  ;;  %v348_v32 = vadd.f32 %v345_v30, %v340_v29 }
 0x23f   :  { %v349_v33 = vmax.f32 %v347_v31, 0.0  ;;  %v350_v35 = vmax.f32 %v348_v32, 0.0 }
 0x241   :  { %v543_v36 = vpack.c.bf16 %v350_v35, %v349_v33 }
 0x243   :  { %544 = vst [vmem:[#allocation4] sm:$0xff] %v543_v36  }
 0x244   :  { %727 = dma.done.wait [#allocation3], 1024 }
 0x245   :  { %728 = vsyncadd [#allocation3], 4294966272  ;;  %591 = vmatprep.subr.bf16.mxu0 %v734_v0  ;;  %607 = vmatprep.mubr.msk.bf16.mxu0 %vm735_vm0, %v734_v0  ;;  %v632_v37 = vld [vmem:[#allocation2 + $0x38] sm:$0xff]   ;;  %v633_v38 = vld [vmem:[#allocation2 + $0x30] sm:$0xff]   ;;  %vm483_vm2 = vcmask 64512  }
 0x246   :  { %592 = vmatpush3.bf16.msra.mxu0 %v632_v37  ;;  %v634_v34 = vld [vmem:[#allocation2 + $0x28] sm:$0xff]   ;;  %v635_v39 = vld [vmem:[#allocation2 + $0x20] sm:$0xff]   ;;  %v636_v40 = vld [vmem:[#allocation2 + $0x18] sm:$0xff]  }
 0x247   :  { %593 = vmatprep.subr.bf16.mxu0 %v734_v0  ;;  %v637_v41 = vld [vmem:[#allocation2 + $0x10] sm:$0xff]   ;;  %v638_v42 = vld [vmem:[#allocation2 + $0x8] sm:$0xff]   ;;  %v639_v43 = vld [vmem:[#allocation2] sm:$0xff]  }
 0x248   :  { %v519_v45 = vld [vmem:[%s874_s8] ss:$0 sm:$0xff] }
 0x24a   :  { %594 = vmatpush3.bf16.msra.mxu0 %v633_v38  ;;  %v640_v44 = vld [vmem:[#allocation4] sm:$0xff]  }
 0x24b   :  { %595 = vmatprep.subr.bf16.mxu0 %v734_v0 }
 0x24e   :  { %596 = vmatpush3.bf16.msra.mxu0 %v634_v34 }
 0x24f   :  { %597 = vmatprep.subr.bf16.mxu0 %v734_v0 }
 0x252   :  { %598 = vmatpush3.bf16.msra.mxu0 %v635_v39 }
 0x253   :  { %599 = vmatprep.subr.bf16.mxu0 %v734_v0 }
 0x256   :  { %600 = vmatpush3.bf16.msra.mxu0 %v636_v40 }
 0x257   :  { %601 = vmatprep.subr.bf16.mxu0 %v734_v0 }
 0x25a   :  { %602 = vmatpush3.bf16.msra.mxu0 %v637_v41 }
 0x25b   :  { %603 = vmatprep.subr.bf16.mxu0 %v734_v0 }
 0x25e   :  { %604 = vmatpush3.bf16.msra.mxu0 %v638_v42 }
 0x25f   :  { %605 = vmatprep.subr.bf16.mxu0 %v734_v0 }
 0x262   :  { %606 = vmatpush3.bf16.msra.mxu0 %v639_v43 }
 0x265   :  { %608 = vmatmul.mubr.bf16.vlgmr.msra.gmra.mxu0 %v640_v44 }
 0x325   :  { %v476_v46 = vpop.f32.mrf.mxu0 }
 0x326   :  { %v477_v47 = vadd.f32 %v519_v45, %v476_v46 }
 0x327   :  { %v609_v48 = vpop.f32.mrf.mxu0 }
 0x328   :  { %484 = vst.msk [vmem:[%s875_s9] sm:$0xff] %vm483_vm2, %v477_v47 }
 0x329   :  { %v479_v49 = vpop.f32.mrf.mxu0 }
 0x32a   :  { %v480_v50 = vadd.f32 %v519_v45, %v479_v49 }
 0x32b   :  { %v610_v51 = vpop.f32.mrf.mxu0 }
 0x32c   :  { %485 = vst.msk [vmem:[%s875_s9 + $0x8] sm:$0xff] %vm483_vm2, %v480_v50 }
 0x32d   :  { %490 = vsyncpa [#allocation6], 1 }
 0x32e   :  { %491 = vsyncmov [#allocation3] }
 0x331   :  { %s492_s15 = vpop.sfrf %491 }
 0x332   :  { %p529_p5 = scmp.ne.s32.totalorder %s492_s15, 0 }
 0x334   :  { %496 = shalt.err (%p529_p5)  }
 0x335   :  { %498 = vsyncmov [#allocation3 + $0x1] }
 0x338   :  { %s499_s8 = vpop.sfrf %498 }
 0x339   :  { %p530_p6 = scmp.ne.s32.totalorder %s499_s8, 0 }
 0x33b   :  { %503 = shalt.err (%p530_p6)  }

</bundles_post_ra>
